<compile_context>
chip_gen: v7x
topology: tpu7x:2x2x1
jax: 0.10.0
libtpu: 0.0.40
codegen_flags: <defaults>
</compile_context>

<pallas_src>
import jax
import jax.numpy as jnp
from jax.experimental import pallas as pl
from jax.experimental.pallas import tpu as pltpu

_LANES = 128
_PAD_LOGIT = -30000.0  # sigmoid(pad) == 0 and BCE(pad, 0) == 0 exactly (f16/bf16/f32)


def _round_up(a, b):
    return ((a + b - 1) // b) * b


def _sublane_multiple(dtype):
    # Min second-to-last tile dim: 8 for 32-bit, 16 for 16-bit, 32 for 8-bit.
    bits = jnp.dtype(dtype).itemsize * 8
    return max(8, 256 // bits)


def _num_tensorcores():
    # 2 TensorCores per chip only on v7x; 1 on v5e/v6e.  Fallback to 1 (always correct).
    try:
        kind = jax.devices()[0].device_kind.lower()
    except Exception:
        return 1
    return 2 if ("v7" in kind or "7x" in kind) else 1


def _make_kernel(block_rows, tiles_per_core, rows):
    """Kernel producing per-core partial sums.

    acc_ref / o_ref[c] layout: (3, 8, 128) f32
      [0] : sum(p) + sum(t)
      [1] : sum(p * t)          (intersection)
      [2] : sum(elementwise BCE)
    """

    def kernel(x_ref, t_ref, o_ref, acc_ref):
        c = pl.program_id(0)
        i = pl.program_id(1)

        @pl.when(i == 0)
        def _():
            acc_ref[...] = jnp.zeros_like(acc_ref)

        g = c * tiles_per_core + i           # global (unclamped) tile index
        valid = rows - g * block_rows        # valid rows in this tile

        def accumulate(x, t):
            # sigmoid + BCE in logits space: one exp + one log1p per element.
            e = jnp.exp(-jnp.abs(x))                                   # EUP
            p = jnp.where(x >= 0, 1.0, e) * pl.reciprocal(1.0 + e, approx=False)
            # -(t*log(p) + (1-t)*log(1-p)) == max(x,0) - x*t + log1p(exp(-|x|))
            bce = jnp.maximum(x, 0.0) - x * t + jnp.log1p(e)

            def vreg_sum(v):
                # (block_rows, 128) -> (block_rows//8, 8, 128) -> (8, 128):
                # layout-preserving reshape + VALU adds only.
                return jnp.sum(v.reshape(-1, 8, _LANES), axis=0)

            acc_ref[0] += vreg_sum(p + t)
            acc_ref[1] += vreg_sum(p * t)
            acc_ref[2] += vreg_sum(bce)

        @pl.when(valid >= block_rows)        # fast path: full tile, no masking
        def _():
            accumulate(x_ref[...].astype(jnp.float32),
                       t_ref[...].astype(jnp.float32))

        @pl.when(valid < block_rows)         # ragged tail / fully-padded tile
        def _():
            row = jax.lax.broadcasted_iota(jnp.int32, (block_rows, 1), 0)
            m = row < valid
            # Masked elements become (x=-30000, t=0) -> p=0, bce=0 exactly.
            accumulate(jnp.where(m, x_ref[...].astype(jnp.float32), _PAD_LOGIT),
                       jnp.where(m, t_ref[...].astype(jnp.float32), 0.0))

        @pl.when(i == tiles_per_core - 1)
        def _():
            o_ref[0] = acc_ref[...]

    return kernel


def dice_bce_loss(logits, targets, smooth=1.0, block_rows=2048):
    """Dice + BCE loss matching PyTorch DiceBCELoss.forward semantics."""
    x = logits.reshape(-1)
    t = targets.reshape(-1)
    if t.dtype == jnp.bool_:
        # i8 is handled more robustly than i1 by Mosaic; still 4x fewer HBM
        # bytes than f32.  Other dtypes (int8/bf16/f32) pass through natively.
        t = t.astype(jnp.int8)
    n = x.shape[0]

    row_align = max(_sublane_multiple(x.dtype), _sublane_multiple(t.dtype))
    chunk = row_align * _LANES

    # Only pad when the element count is not aligned to a minimal row group
    # (rare; at most ~4K elements).  Aligned inputs incur zero extra copies.
    pad = (-n) % chunk
    if pad:
        x = jnp.pad(x, (0, pad), constant_values=_PAD_LOGIT)
        t = jnp.pad(t, (0, pad))
    rows = (n + pad) // _LANES

    # Free (layout-preserving) reshape of the contiguous flat arrays.
    x2 = x.reshape(rows, _LANES)
    t2 = t.reshape(rows, _LANES)

    # Tile geometry: block_rows a multiple of the dtype sublane tile, <= rows.
    block_rows = min(_round_up(block_rows, row_align), rows)
    tiles_needed = pl.cdiv(rows, block_rows)

    ncores = _num_tensorcores()
    tiles_per_core = pl.cdiv(tiles_needed, ncores)

    def tile_map(c, i):
        # Clamp so a fully out-of-range tile (dual-core round-up) re-reads the
        # last valid tile; the kernel masks it to a zero contribution.
        return (jnp.minimum(c * tiles_per_core + i, tiles_needed - 1), 0)

    kernel = _make_kernel(block_rows, tiles_per_core, rows)

    partials = pl.pallas_call(
        kernel,
        out_shape=jax.ShapeDtypeStruct((ncores, 3, 8, _LANES), jnp.float32),
        grid_spec=pltpu.PrefetchScalarGridSpec(
            num_scalar_prefetch=0,
            grid=(ncores, tiles_per_core),
            in_specs=[
                pl.BlockSpec((block_rows, _LANES), tile_map),
                pl.BlockSpec((block_rows, _LANES), tile_map),
            ],
            out_specs=pl.BlockSpec((1, 3, 8, _LANES), lambda c, i: (c, 0, 0, 0)),
            scratch_shapes=[pltpu.VMEM((3, 8, _LANES), jnp.float32)],
        ),
        compiler_params=pltpu.CompilerParams(
            dimension_semantics=("parallel", "arbitrary"),
        ),
    )(x2, t2)

    # Tiny epilogue on the (ncores, 3, 8, 128) per-core partials.
    sums = jnp.sum(partials, axis=(0, 2, 3))          # (3,)
    sum_p_plus_t, sum_pt, sum_bce = sums[0], sums[1], sums[2]
    dice_loss = 1.0 - (2.0 * sum_pt + smooth) / (sum_p_plus_t + smooth)
    bce_mean = sum_bce / n
    return bce_mean + dice_loss


def _dice_bce_ref(logits, targets, smooth=1.0):
    p = jax.nn.sigmoid(logits.reshape(-1).astype(jnp.float32))
    t = targets.reshape(-1).astype(jnp.float32)
    inter = jnp.sum(p * t)
    dice = 1.0 - (2.0 * inter + smooth) / (jnp.sum(p) + jnp.sum(t) + smooth)
    bce = jnp.mean(-(t * jnp.log(p) + (1.0 - t) * jnp.log1p(-p)))
    return bce + dice


if __name__ == "__main__":
    key = jax.random.PRNGKey(0)
    k1, k2 = jax.random.split(key)
    # NCHW logits, binary targets in {0., 1.}
    x = jax.random.normal(k1, (2, 4, 16, 16), dtype=jnp.float32)
    y = (jax.random.uniform(k2, (2, 4, 16, 16)) > 0.5).astype(jnp.float32)

    loss = dice_bce_loss(x, y, smooth=1.0)
    jax.block_until_ready(loss)

    ref = _dice_bce_ref(x, y, smooth=1.0)
    assert jnp.allclose(loss, ref, rtol=1e-5, atol=1e-5), (loss, ref)
    print("KERNEL_OK")
</pallas_src>

<mosaic_0001>
module attributes {stable_mosaic.version = 11 : i64} {
  func.func @kernel(%arg0: i32, %arg1: i32, %arg2: memref<16x128xf32, #tpu.memory_space<vmem>>, %arg3: memref<16x128xf32, #tpu.memory_space<vmem>>, %arg4: memref<1x3x8x128xf32, #tpu.memory_space<vmem>>, %arg5: memref<3x8x128xf32, #tpu.memory_space<vmem>>) attributes {dimension_semantics = [#tpu.dimension_semantics<parallel>, #tpu.dimension_semantics<arbitrary>], iteration_bounds = array<i64: 1, 1>, scalar_prefetch = 0 : i64, scratch_operands = 1 : i64, tpu.core_type = #tpu.core_type<tc>, window_params = [{transform_indices = @transform_0, window_bounds = array<i64: 16, 128>}, {transform_indices = @transform_1, window_bounds = array<i64: 16, 128>}, {transform_indices = @transform_2, window_bounds = array<i64: 1, 3, 8, 128>}]} {
    %c0_i32 = arith.constant 0 : i32
    %0 = arith.cmpi eq, %arg1, %c0_i32 : i32
    %1 = arith.extui %0 : i1 to i32
    %c0_i32_0 = arith.constant 0 : i32
    %2 = arith.cmpi ne, %1, %c0_i32_0 : i32
    scf.if %2 {
      %cst = arith.constant 0.000000e+00 : f32
      %16 = vector.broadcast %cst : f32 to vector<3x8x128xf32>
      %c0 = arith.constant 0 : index
      %c0_8 = arith.constant 0 : index
      %c0_9 = arith.constant 0 : index
      %17 = vector.load %arg5[%c0, %c0_8, %c0_9] : memref<3x8x128xf32, #tpu.memory_space<vmem>>, vector<3x8x128xf32>
      tpu.vector_store %arg5[%c0, %c0_8, %c0_9], %16 {strides = array<i32>} : memref<3x8x128xf32, #tpu.memory_space<vmem>>, vector<3x8x128xf32>,
    } else {
    }
    %c1_i32 = arith.constant 1 : i32
    %3 = arith.muli %arg0, %c1_i32 : i32
    %4 = arith.addi %3, %arg1 : i32
    %c16_i32 = arith.constant 16 : i32
    %5 = arith.muli %4, %c16_i32 : i32
    %c16_i32_1 = arith.constant 16 : i32
    %6 = arith.subi %c16_i32_1, %5 : i32
    %c16_i32_2 = arith.constant 16 : i32
    %7 = arith.cmpi sge, %6, %c16_i32_2 : i32
    %8 = arith.extui %7 : i1 to i32
    %c0_i32_3 = arith.constant 0 : i32
    %9 = arith.cmpi ne, %8, %c0_i32_3 : i32
    scf.if %9 {
      %c0 = arith.constant 0 : index
      %c0_8 = arith.constant 0 : index
      %16 = vector.load %arg2[%c0, %c0_8] : memref<16x128xf32, #tpu.memory_space<vmem>>, vector<16x128xf32>
      %c0_9 = arith.constant 0 : index
      %c0_10 = arith.constant 0 : index
      %17 = vector.load %arg3[%c0_9, %c0_10] : memref<16x128xf32, #tpu.memory_space<vmem>>, vector<16x128xf32>
      %18 = math.absf %16 : vector<16x128xf32>
      %cst = arith.constant 0.000000e+00 : f32
      %19 = vector.broadcast %cst : f32 to vector<16x128xf32>
      %20 = arith.subf %19, %18 : vector<16x128xf32>
      %21 = math.exp %20 : vector<16x128xf32>
      %cst_11 = arith.constant 0.000000e+00 : f32
      %22 = vector.broadcast %cst_11 : f32 to vector<16x128xf32>
      %23 = arith.cmpf oge, %16, %22 : vector<16x128xf32>
      %cst_12 = arith.constant 1.000000e+00 : f32
      %24 = vector.broadcast %cst_12 : f32 to vector<16x128xf32>
      %25 = arith.select %23, %24, %21 : vector<16x128xi1>, vector<16x128xf32>
      %cst_13 = arith.constant 1.000000e+00 : f32
      %26 = vector.broadcast %cst_13 : f32 to vector<16x128xf32>
      %27 = arith.addf %26, %21 : vector<16x128xf32>
      %28 = tpu.reciprocal %27 : vector<16x128xf32> -> vector<16x128xf32>
      %29 = arith.mulf %25, %28 : vector<16x128xf32>
      %cst_14 = arith.constant 0.000000e+00 : f32
      %30 = vector.broadcast %cst_14 : f32 to vector<16x128xf32>
      %31 = arith.maximumf %16, %30 : vector<16x128xf32>
      %32 = arith.mulf %16, %17 : vector<16x128xf32>
      %33 = arith.subf %31, %32 : vector<16x128xf32>
      %34 = math.log1p %21 : vector<16x128xf32>
      %35 = arith.addf %33, %34 : vector<16x128xf32>
      %c0_15 = arith.constant 0 : index
      %c0_16 = arith.constant 0 : index
      %c0_17 = arith.constant 0 : index
      %36 = vector.load %arg5[%c0_15, %c0_16, %c0_17] : memref<3x8x128xf32, #tpu.memory_space<vmem>>, vector<1x8x128xf32>
      %37 = vector.shape_cast %36 : vector<1x8x128xf32> to vector<8x128xf32>
      %38 = arith.addf %29, %17 : vector<16x128xf32>
      %39 = vector.shape_cast %38 : vector<16x128xf32> to vector<2x8x128xf32>
      %cst_18 = arith.constant dense<0.000000e+00> : vector<8x128xf32>
      %40 = vector.multi_reduction <add>, %39, %cst_18 [0] : vector<2x8x128xf32> to vector<8x128xf32>
      %41 = arith.addf %37, %40 : vector<8x128xf32>
      %c0_19 = arith.constant 0 : index
      %c0_20 = arith.constant 0 : index
      %c0_21 = arith.constant 0 : index
      %42 = vector.load %arg5[%c0_19, %c0_20, %c0_21] : memref<3x8x128xf32, #tpu.memory_space<vmem>>, vector<1x8x128xf32>
      %43 = vector.shape_cast %42 : vector<1x8x128xf32> to vector<8x128xf32>
      %44 = vector.shape_cast %41 : vector<8x128xf32> to vector<1x8x128xf32>
      tpu.vector_store %arg5[%c0_19, %c0_20, %c0_21], %44 {strides = array<i32>} : memref<3x8x128xf32, #tpu.memory_space<vmem>>, vector<1x8x128xf32>,
      %c1 = arith.constant 1 : index
      %c0_22 = arith.constant 0 : index
      %c0_23 = arith.constant 0 : index
      %45 = vector.load %arg5[%c1, %c0_22, %c0_23] : memref<3x8x128xf32, #tpu.memory_space<vmem>>, vector<1x8x128xf32>
      %46 = vector.shape_cast %45 : vector<1x8x128xf32> to vector<8x128xf32>
      %47 = arith.mulf %29, %17 : vector<16x128xf32>
      %48 = vector.shape_cast %47 : vector<16x128xf32> to vector<2x8x128xf32>
      %cst_24 = arith.constant dense<0.000000e+00> : vector<8x128xf32>
      %49 = vector.multi_reduction <add>, %48, %cst_24 [0] : vector<2x8x128xf32> to vector<8x128xf32>
      %50 = arith.addf %46, %49 : vector<8x128xf32>
      %c1_25 = arith.constant 1 : index
      %c0_26 = arith.constant 0 : index
      %c0_27 = arith.constant 0 : index
      %51 = vector.load %arg5[%c1_25, %c0_26, %c0_27] : memref<3x8x128xf32, #tpu.memory_space<vmem>>, vector<1x8x128xf32>
      %52 = vector.shape_cast %51 : vector<1x8x128xf32> to vector<8x128xf32>
      %53 = vector.shape_cast %50 : vector<8x128xf32> to vector<1x8x128xf32>
      tpu.vector_store %arg5[%c1_25, %c0_26, %c0_27], %53 {strides = array<i32>} : memref<3x8x128xf32, #tpu.memory_space<vmem>>, vector<1x8x128xf32>,
      %c2 = arith.constant 2 : index
      %c0_28 = arith.constant 0 : index
      %c0_29 = arith.constant 0 : index
      %54 = vector.load %arg5[%c2, %c0_28, %c0_29] : memref<3x8x128xf32, #tpu.memory_space<vmem>>, vector<1x8x128xf32>
      %55 = vector.shape_cast %54 : vector<1x8x128xf32> to vector<8x128xf32>
      %56 = vector.shape_cast %35 : vector<16x128xf32> to vector<2x8x128xf32>
      %cst_30 = arith.constant dense<0.000000e+00> : vector<8x128xf32>
      %57 = vector.multi_reduction <add>, %56, %cst_30 [0] : vector<2x8x128xf32> to vector<8x128xf32>
      %58 = arith.addf %55, %57 : vector<8x128xf32>
      %c2_31 = arith.constant 2 : index
      %c0_32 = arith.constant 0 : index
      %c0_33 = arith.constant 0 : index
      %59 = vector.load %arg5[%c2_31, %c0_32, %c0_33] : memref<3x8x128xf32, #tpu.memory_space<vmem>>, vector<1x8x128xf32>
      %60 = vector.shape_cast %59 : vector<1x8x128xf32> to vector<8x128xf32>
      %61 = vector.shape_cast %58 : vector<8x128xf32> to vector<1x8x128xf32>
      tpu.vector_store %arg5[%c2_31, %c0_32, %c0_33], %61 {strides = array<i32>} : memref<3x8x128xf32, #tpu.memory_space<vmem>>, vector<1x8x128xf32>,
    } else {
    }
    %c16_i32_4 = arith.constant 16 : i32
    %10 = arith.cmpi slt, %6, %c16_i32_4 : i32
    %11 = arith.extui %10 : i1 to i32
    %c0_i32_5 = arith.constant 0 : i32
    %12 = arith.cmpi ne, %11, %c0_i32_5 : i32
    scf.if %12 {
      %16 = tpu.iota {dimensions = array<i32: 0>} : vector<16x1xi32>
      %17 = vector.broadcast %6 : i32 to vector<16x1xi32>
      %18 = arith.cmpi slt, %16, %17 : vector<16x1xi32>
      %c0 = arith.constant 0 : index
      %c0_8 = arith.constant 0 : index
      %19 = vector.load %arg2[%c0, %c0_8] : memref<16x128xf32, #tpu.memory_space<vmem>>, vector<16x128xf32>
      %cst = arith.constant -3.000000e+04 : f32
      %20 = vector.shape_cast %18 : vector<16x1xi1> to vector<16x1xi1>
      %21 = vector.broadcast %20 : vector<16x1xi1> to vector<16x128xi1>
      %22 = vector.broadcast %cst : f32 to vector<16x128xf32>
      %23 = arith.select %21, %19, %22 : vector<16x128xi1>, vector<16x128xf32>
      %c0_9 = arith.constant 0 : index
      %c0_10 = arith.constant 0 : index
      %24 = vector.load %arg3[%c0_9, %c0_10] : memref<16x128xf32, #tpu.memory_space<vmem>>, vector<16x128xf32>
      %cst_11 = arith.constant 0.000000e+00 : f32
      %25 = vector.shape_cast %18 : vector<16x1xi1> to vector<16x1xi1>
      %26 = vector.broadcast %25 : vector<16x1xi1> to vector<16x128xi1>
      %27 = vector.broadcast %cst_11 : f32 to vector<16x128xf32>
      %28 = arith.select %26, %24, %27 : vector<16x128xi1>, vector<16x128xf32>
      %29 = math.absf %23 : vector<16x128xf32>
      %cst_12 = arith.constant 0.000000e+00 : f32
      %30 = vector.broadcast %cst_12 : f32 to vector<16x128xf32>
      %31 = arith.subf %30, %29 : vector<16x128xf32>
      %32 = math.exp %31 : vector<16x128xf32>
      %cst_13 = arith.constant 0.000000e+00 : f32
      %33 = vector.broadcast %cst_13 : f32 to vector<16x128xf32>
      %34 = arith.cmpf oge, %23, %33 : vector<16x128xf32>
      %cst_14 = arith.constant 1.000000e+00 : f32
      %35 = vector.broadcast %cst_14 : f32 to vector<16x128xf32>
      %36 = arith.select %34, %35, %32 : vector<16x128xi1>, vector<16x128xf32>
      %cst_15 = arith.constant 1.000000e+00 : f32
      %37 = vector.broadcast %cst_15 : f32 to vector<16x128xf32>
      %38 = arith.addf %37, %32 : vector<16x128xf32>
      %39 = tpu.reciprocal %38 : vector<16x128xf32> -> vector<16x128xf32>
      %40 = arith.mulf %36, %39 : vector<16x128xf32>
      %cst_16 = arith.constant 0.000000e+00 : f32
      %41 = vector.broadcast %cst_16 : f32 to vector<16x128xf32>
      %42 = arith.maximumf %23, %41 : vector<16x128xf32>
      %43 = arith.mulf %23, %28 : vector<16x128xf32>
      %44 = arith.subf %42, %43 : vector<16x128xf32>
      %45 = math.log1p %32 : vector<16x128xf32>
      %46 = arith.addf %44, %45 : vector<16x128xf32>
      %c0_17 = arith.constant 0 : index
      %c0_18 = arith.constant 0 : index
      %c0_19 = arith.constant 0 : index
      %47 = vector.load %arg5[%c0_17, %c0_18, %c0_19] : memref<3x8x128xf32, #tpu.memory_space<vmem>>, vector<1x8x128xf32>
      %48 = vector.shape_cast %47 : vector<1x8x128xf32> to vector<8x128xf32>
      %49 = arith.addf %40, %28 : vector<16x128xf32>
      %50 = vector.shape_cast %49 : vector<16x128xf32> to vector<2x8x128xf32>
      %cst_20 = arith.constant dense<0.000000e+00> : vector<8x128xf32>
      %51 = vector.multi_reduction <add>, %50, %cst_20 [0] : vector<2x8x128xf32> to vector<8x128xf32>
      %52 = arith.addf %48, %51 : vector<8x128xf32>
      %c0_21 = arith.constant 0 : index
      %c0_22 = arith.constant 0 : index
      %c0_23 = arith.constant 0 : index
      %53 = vector.load %arg5[%c0_21, %c0_22, %c0_23] : memref<3x8x128xf32, #tpu.memory_space<vmem>>, vector<1x8x128xf32>
      %54 = vector.shape_cast %53 : vector<1x8x128xf32> to vector<8x128xf32>
      %55 = vector.shape_cast %52 : vector<8x128xf32> to vector<1x8x128xf32>
      tpu.vector_store %arg5[%c0_21, %c0_22, %c0_23], %55 {strides = array<i32>} : memref<3x8x128xf32, #tpu.memory_space<vmem>>, vector<1x8x128xf32>,
      %c1 = arith.constant 1 : index
      %c0_24 = arith.constant 0 : index
      %c0_25 = arith.constant 0 : index
      %56 = vector.load %arg5[%c1, %c0_24, %c0_25] : memref<3x8x128xf32, #tpu.memory_space<vmem>>, vector<1x8x128xf32>
      %57 = vector.shape_cast %56 : vector<1x8x128xf32> to vector<8x128xf32>
      %58 = arith.mulf %40, %28 : vector<16x128xf32>
      %59 = vector.shape_cast %58 : vector<16x128xf32> to vector<2x8x128xf32>
      %cst_26 = arith.constant dense<0.000000e+00> : vector<8x128xf32>
      %60 = vector.multi_reduction <add>, %59, %cst_26 [0] : vector<2x8x128xf32> to vector<8x128xf32>
      %61 = arith.addf %57, %60 : vector<8x128xf32>
      %c1_27 = arith.constant 1 : index
      %c0_28 = arith.constant 0 : index
      %c0_29 = arith.constant 0 : index
      %62 = vector.load %arg5[%c1_27, %c0_28, %c0_29] : memref<3x8x128xf32, #tpu.memory_space<vmem>>, vector<1x8x128xf32>
      %63 = vector.shape_cast %62 : vector<1x8x128xf32> to vector<8x128xf32>
      %64 = vector.shape_cast %61 : vector<8x128xf32> to vector<1x8x128xf32>
      tpu.vector_store %arg5[%c1_27, %c0_28, %c0_29], %64 {strides = array<i32>} : memref<3x8x128xf32, #tpu.memory_space<vmem>>, vector<1x8x128xf32>,
      %c2 = arith.constant 2 : index
      %c0_30 = arith.constant 0 : index
      %c0_31 = arith.constant 0 : index
      %65 = vector.load %arg5[%c2, %c0_30, %c0_31] : memref<3x8x128xf32, #tpu.memory_space<vmem>>, vector<1x8x128xf32>
      %66 = vector.shape_cast %65 : vector<1x8x128xf32> to vector<8x128xf32>
      %67 = vector.shape_cast %46 : vector<16x128xf32> to vector<2x8x128xf32>
      %cst_32 = arith.constant dense<0.000000e+00> : vector<8x128xf32>
      %68 = vector.multi_reduction <add>, %67, %cst_32 [0] : vector<2x8x128xf32> to vector<8x128xf32>
      %69 = arith.addf %66, %68 : vector<8x128xf32>
      %c2_33 = arith.constant 2 : index
      %c0_34 = arith.constant 0 : index
      %c0_35 = arith.constant 0 : index
      %70 = vector.load %arg5[%c2_33, %c0_34, %c0_35] : memref<3x8x128xf32, #tpu.memory_space<vmem>>, vector<1x8x128xf32>
      %71 = vector.shape_cast %70 : vector<1x8x128xf32> to vector<8x128xf32>
      %72 = vector.shape_cast %69 : vector<8x128xf32> to vector<1x8x128xf32>
      tpu.vector_store %arg5[%c2_33, %c0_34, %c0_35], %72 {strides = array<i32>} : memref<3x8x128xf32, #tpu.memory_space<vmem>>, vector<1x8x128xf32>,
    } else {
    }
    %c0_i32_6 = arith.constant 0 : i32
    %13 = arith.cmpi eq, %arg1, %c0_i32_6 : i32
    %14 = arith.extui %13 : i1 to i32
    %c0_i32_7 = arith.constant 0 : i32
    %15 = arith.cmpi ne, %14, %c0_i32_7 : i32
    scf.if %15 {
      %c0 = arith.constant 0 : index
      %c0_8 = arith.constant 0 : index
      %c0_9 = arith.constant 0 : index
      %16 = vector.load %arg5[%c0, %c0_8, %c0_9] : memref<3x8x128xf32, #tpu.memory_space<vmem>>, vector<3x8x128xf32>
      %c0_10 = arith.constant 0 : index
      %c0_11 = arith.constant 0 : index
      %c0_12 = arith.constant 0 : index
      %c0_13 = arith.constant 0 : index
      %17 = vector.load %arg4[%c0_10, %c0_11, %c0_12, %c0_13] : memref<1x3x8x128xf32, #tpu.memory_space<vmem>>, vector<1x3x8x128xf32>
      %18 = vector.shape_cast %17 : vector<1x3x8x128xf32> to vector<3x8x128xf32>
      %19 = vector.shape_cast %16 : vector<3x8x128xf32> to vector<1x3x8x128xf32>
      tpu.vector_store %arg4[%c0_10, %c0_11, %c0_12, %c0_13], %19 {strides = array<i32>} : memref<1x3x8x128xf32, #tpu.memory_space<vmem>>, vector<1x3x8x128xf32>,
    } else {
    }
    return
  }
  func.func @transform_0(%arg0: i32, %arg1: i32) -> (i32, i32) {
    %c1_i32 = arith.constant 1 : i32
    %0 = arith.muli %arg0, %c1_i32 : i32
    %1 = arith.addi %0, %arg1 : i32
    %c0_i32 = arith.constant 0 : i32
    %2 = arith.minsi %1, %c0_i32 : i32
    %c0_i32_0 = arith.constant 0 : i32
    %c0_i32_1 = arith.constant 0 : i32
    return %2, %c0_i32_0 : i32, i32
  }
  func.func @transform_1(%arg0: i32, %arg1: i32) -> (i32, i32) {
    %c1_i32 = arith.constant 1 : i32
    %0 = arith.muli %arg0, %c1_i32 : i32
    %1 = arith.addi %0, %arg1 : i32
    %c0_i32 = arith.constant 0 : i32
    %2 = arith.minsi %1, %c0_i32 : i32
    %c0_i32_0 = arith.constant 0 : i32
    %c0_i32_1 = arith.constant 0 : i32
    return %2, %c0_i32_0 : i32, i32
  }
  func.func @transform_2(%arg0: i32, %arg1: i32) -> (i32, i32, i32, i32) {
    %c0_i32 = arith.constant 0 : i32
    %c0_i32_0 = arith.constant 0 : i32
    %c0_i32_1 = arith.constant 0 : i32
    %c0_i32_2 = arith.constant 0 : i32
    return %arg0, %c0_i32, %c0_i32_0, %c0_i32_1 : i32, i32, i32, i32
  }
}

</mosaic_0001>

<bundles_post_ra>
// kernel: tpu_custom_call.1
= control target key start
LH: loop header
LB: loop body
LE: loop exit
PB: predicated region body
PF: predicated region fallthrough
CT: control target
= control target key end

     0   :  { %7 = vsyncpa [#allocation4], 0  ;;  %s409_s0 = inlined_call_operand.hbm [shape: f32[16,128], index: 0, kind: input, shape index: {}]   ;;  %s410_s1 = inlined_call_operand.hbm [shape: f32[16,128], index: 1, kind: input, shape index: {}]   ;;  %s411_s2 = inlined_call_operand.hbm [shape: f32[1,3,8,128], index: 2, kind: output, shape index: {}]  }
   0x1   :  { %8 = vsyncpa [#allocation7], 0 }
   0x2   :  { %9 = vsyncpa [#allocation5], 0  ;;  %s344_s9 = smov [#allocation3]   ;;  %s272_s13 = scalar_lea.hbm %s409_s0, 256 }
   0x3   :  { %s21_s10 = sshll.u32 %s344_s9, 4  ;;  %p273_p0 = scmp.ne.s32.totalorder %s409_s0, %s272_s13  ;;  %s22_s10 = int_to_ptr.vmem [resolvable:$true] %s21_s10 }
   0x4   :  { %p276_p1 = scmp.lt.u32.totalorder %s272_s13, %s409_s0 }
   0x6   :  { %p278_p2 = pnand %p276_p1, %p273_p0 }
   0x8   :  { %281 = shalt.err (!%p278_p2)
}
   0x9   :  { %s282_s18 = scalar_lea.vmem %s22_s10, 256  ;;  %p287_p4 = scmp.lt.s32.totalorder %s22_s10, %s22_s10 }
   0xa   :  { %p283_p3 = scmp.ne.s32.totalorder %s22_s10, %s282_s18  ;;  %p288_p5 = scmp.lt.s32.totalorder %s282_s18, %s282_s18 }
   0xc   :  { %p289_p6 = por %p288_p5, %p287_p4 }
   0xe   :  { %p290_p7 = pnand %p289_p6, %p283_p3 }
  0x10   :  { %293 = shalt.err (!%p290_p7)
}
  0x11   :  { %s345_s19 = smov 128   ;;  %s346_s20 = smov 8  }
  0x12   :  { %27 = dma.hbm_to_vmem [thread:$0]  %s409_s0, 256, %s22_s10, [#allocation4], %s345_s19, %s345_s19, %s346_s20  }
  0x13   :  { %s347_s23 = smov [#allocation6]   ;;  %s294_s27 = scalar_lea.hbm %s410_s1, 256 }
  0x14   :  { %s39_s24 = sshll.u32 %s347_s23, 4  ;;  %p295_p8 = scmp.ne.s32.totalorder %s410_s1, %s294_s27  ;;  %s40_s24 = int_to_ptr.vmem [resolvable:$true] %s39_s24 }
  0x15   :  { %p298_p9 = scmp.lt.u32.totalorder %s294_s27, %s410_s1 }
  0x17   :  { %p300_p10 = pnand %p298_p9, %p295_p8 }
  0x19   :  { %303 = shalt.err (!%p300_p10)
}
  0x1a   :  { %s304_s4 = scalar_lea.vmem %s40_s24, 256  ;;  %p309_p12 = scmp.lt.s32.totalorder %s40_s24, %s40_s24 }
  0x1b   :  { %p305_p11 = scmp.ne.s32.totalorder %s40_s24, %s304_s4  ;;  %p310_p13 = scmp.lt.s32.totalorder %s304_s4, %s304_s4 }
  0x1d   :  { %p311_p0 = por %p310_p13, %p309_p12 }
  0x1f   :  { %p312_p1 = pnand %p311_p0, %p305_p11 }
  0x21   :  { %315 = shalt.err (!%p312_p1)
}
  0x22   :  { %45 = dma.hbm_to_vmem [thread:$0]  %s410_s1, 256, %s40_s24, [#allocation7], %s345_s19, %s345_s19, %s346_s20  }
  0x23   :  { %338 = dma.done.wait [#allocation4], 256  }
  0x24   :  { %339 = vsyncadd [#allocation4], 4294967040 }
  0x25   :  { %340 = dma.done.wait [#allocation7], 256  }
  0x26   :  { %341 = vsyncadd [#allocation7], 4294967040  ;;  %v74_v0 = vld [vmem:[#allocation3] sm:$0xff]  ;;  %v75_v1 = vld [vmem:[#allocation3 + $0x8] sm:$0xff]  ;;  %s348_s1 = smov [#allocation8]  }
  0x27   :  { %v78_v2 = vand.u32 2147483647, %v74_v0  ;;  %v79_v3 = vand.u32 2147483647, %v75_v1  ;;  %v76_v13 = vld [vmem:[#allocation6] sm:$0xff]  ;;  %v77_v15 = vld [vmem:[#allocation6 + $0x8] sm:$0xff] }
  0x28   :  { %vm86_vm0 = vcmp.ge.f32.partialorder %v74_v0, 0.0  ;;  %vm87_vm1 = vcmp.ge.f32.partialorder %v75_v1, 0.0  ;;  %v96_v16 = vmax.f32 %v74_v0, 0.0  ;;  %v97_v17 = vmax.f32 %v75_v1, 0.0  ;;  %s238_s6 = sshll.u32 %s348_s1, 4  ;;  %s239_s6 = int_to_ptr.vmem [resolvable:$true] %s238_s6 }
  0x29   :  { %v80_v4 = vsub.f32 0.0, %v78_v2  ;;  %v81_v5 = vsub.f32 0.0, %v79_v3  ;;  %v98_v18 = vmul.f32 %v76_v13, %v74_v0  ;;  %v99_v21 = vmul.f32 %v77_v15, %v75_v1  ;;  %s316_s7 = scalar_lea.vmem %s239_s6, 384  ;;  %p321_p3 = scmp.lt.s32.totalorder %s239_s6, %s239_s6 }
  0x2a   :  { %p317_p2 = scmp.ne.s32.totalorder %s239_s6, %s316_s7  ;;  %p322_p4 = scmp.lt.s32.totalorder %s316_s7, %s316_s7 }
  0x2b   :  { %v82_v6 = vmul.f32 1.442695, %v80_v4  ;;  %v84_v7 = vmul.f32 1.442695, %v81_v5  ;;  %v100_v29 = vsub.f32 %v96_v16, %v98_v18  ;;  %v101_v33 = vsub.f32 %v97_v17, %v99_v21 }
  0x2c   :  { %p323_p5 = por %p322_p4, %p321_p3 }
  0x2d   :  { %260 = vpow2.f32 %v82_v6 }
  0x2e   :  { %262 = vpow2.f32 %v84_v7  ;;  %p324_p6 = pnand %p323_p5, %p317_p2 }
  0x37   :  { %v261_v8 = vpop.eup %260 }
  0x38   :  { %v263_v9 = vpop.eup %262  ;;  %v90_v10 = vadd.f32 1.0, %v261_v8  ;;  %v105_v12 = vmul.f32 -0.5, %v261_v8  ;;  %v88_v20 = vsel %vm86_vm0, 1.0, %v261_v8  ;;  %v108_v22 = vand.u32 2147483647, %v261_v8 }
  0x39   :  { %v91_v11 = vadd.f32 1.0, %v263_v9  ;;  %v114_v14 = vmul.f32 -0.5, %v263_v9  ;;  %v89_v24 = vsel %vm87_vm1, 1.0, %v263_v9  ;;  %v117_v25 = vand.u32 2147483647, %v263_v9 }
  0x3a   :  { %264 = vrcp.f32 %v90_v10  ;;  %v106_v19 = vadd.f32 1.0, %v105_v12  ;;  %vm109_vm2 = vcmp.lt.f32.partialorder %v108_v22, 0.0004427343 }
  0x3b   :  { %266 = vrcp.f32 %v91_v11  ;;  %v115_v23 = vadd.f32 1.0, %v114_v14  ;;  %vm118_vm3 = vcmp.lt.f32.partialorder %v117_v25, 0.0004427343 }
  0x3c   :  { %268 = vlog2.f32 %v90_v10  ;;  %v107_v30 = vmul.f32 %v261_v8, %v106_v19 }
  0x3d   :  { %270 = vlog2.f32 %v91_v11  ;;  %v116_v34 = vmul.f32 %v263_v9, %v115_v23 }
  0x44   :  { %v265_v26 = vpop.eup %264 }
  0x45   :  { %v267_v27 = vpop.eup %266  ;;  %v94_v28 = vmul.f32 %v265_v26, %v88_v20 }
  0x46   :  { %v269_v31 = vpop.eup %268  ;;  %v95_v32 = vmul.f32 %v267_v27, %v89_v24 }
  0x47   :  { %v271_v35 = vpop.eup %270  ;;  %v123_v36 = vadd.f32 %v94_v28, %v76_v13  ;;  %v130_v37 = vmul.f32 %v94_v28, %v76_v13  ;;  %v104_v38 = vmul.f32 0.6931472, %v269_v31 }
  0x48   :  { %v124_v39 = vadd.f32 %v95_v32, %v77_v15  ;;  %v131_v40 = vmul.f32 %v95_v32, %v77_v15  ;;  %v113_v41 = vmul.f32 0.6931472, %v271_v35 }
  0x49   :  { %v110_v42 = vsel %vm109_vm2, %v107_v30, %v104_v38 }
  0x4a   :  { %v125_v43 = vadd.f32 %v124_v39, %v123_v36  ;;  %v132_v44 = vadd.f32 %v131_v40, %v130_v37  ;;  %v119_v45 = vsel %vm118_vm3, %v116_v34, %v113_v41  ;;  %v120_v46 = vadd.f32 %v110_v42, %v100_v29 }
  0x4b   :  { %v121_v47 = vadd.f32 %v119_v45, %v101_v33 }
  0x4c   :  { %230 = vst [vmem:[#allocation8] sm:$0xff] %v125_v43  ;;  %231 = vst [vmem:[#allocation8 + $0x8] sm:$0xff] %v132_v44 }
  0x4d   :  { %v137_v48 = vadd.f32 %v121_v47, %v120_v46 }
  0x4f   :  { %232 = vst [vmem:[#allocation8 + $0x10] sm:$0xff] %v137_v48 }
  0x50   :  { %327 = shalt.err (!%p324_p6)
}
  0x51   :  { %s328_s10 = scalar_lea.hbm %s411_s2, 384 }
  0x52   :  { %p329_p7 = scmp.ne.s32.totalorder %s411_s2, %s328_s10  ;;  %p332_p8 = scmp.lt.u32.totalorder %s328_s10, %s411_s2 }
  0x54   :  { %p334_p9 = pnand %p332_p8, %p329_p7 }
  0x56   :  { %337 = shalt.err (!%p334_p9)
}
  0x57   :  { %244 = dma.vmem_to_hbm [thread:$0]  %s239_s6, 384, %s411_s2, [#allocation5], %s345_s19, %s345_s19, %s346_s20  }
  0x58   :  { %342 = dma.done.wait [#allocation5], 384  }
  0x59   :  { %343 = vsyncadd [#allocation5], 4294966912 }
  0x5a   :  { %248 = vsyncpa [#allocation4], 1 }
  0x5b   :  { %249 = vsyncpa [#allocation7], 1 }
  0x5c   :  { %250 = vsyncpa [#allocation5], 1 }

</bundles_post_ra>
